<compile_context>
chip_gen: v7x
topology: tpu7x:2x2x1
jax: 0.10.0
libtpu: 0.0.40
codegen_flags: <defaults>
</compile_context>

<pallas_src>
import functools

import jax
import jax.numpy as jnp
import numpy as np
from jax import lax
from jax.experimental import pallas as pl
from jax.experimental.pallas import tpu as pltpu

_LOG_EPS = float(np.log(1e-12))   # reference clamp: log(p + 1e-12) ~= max(log p, -27.63)


def _focal_loss_kernel(pred_ref, mask_ref, out_ref, *,
                       gamma, alpha, lane, block_rows, rows,
                       inner_steps, full_blocks, padded_blocks):
    i = pl.program_id(0)            # core-split axis ("parallel")
    j = pl.program_id(1)            # reduction axis within a split ("arbitrary")
    bi = i * inner_steps + j        # logical row-block index (may be a ghost)

    # The output block (1, acc_rows, lane) is indexed only by `i`, so it stays
    # resident in VMEM across the whole j loop and acts as the accumulator:
    # no separate full-tile scratch, no large RMW per step.
    @pl.when(j == 0)
    def _init():
        out_ref[...] = jnp.zeros_like(out_ref)

    x = pred_ref[...].astype(jnp.float32)   # in-register upcast; HBM stays narrow
    m = mask_ref[...].astype(jnp.float32)

    # Shared-exp log-sigmoid (1 exp + 1 log per element), clamped like the
    # reference's log(p + 1e-12) / log(1 - p + 1e-12):
    #   t = exp(-|x|); log p = min(x,0) - log(1+t); log(1-p) = min(-x,0) - log(1+t)
    t = jnp.exp(-jnp.abs(x))
    log_den = jnp.log(1.0 + t)
    log_p = jnp.maximum(jnp.minimum(x, 0.0) - log_den, _LOG_EPS)
    log_1mp = jnp.maximum(jnp.minimum(-x, 0.0) - log_den, _LOG_EPS)

    # Focal weights on the EUP instead of the VPU:
    #   (1-p)^g = exp(g*log(1-p)),  p^g = exp(g*log(p))
    w_pos = jnp.exp(gamma * log_1mp)
    w_neg = jnp.exp(gamma * log_p)

    loss = (-alpha) * m * w_pos * log_p \
           - (1.0 - alpha) * (1.0 - m) * w_neg * log_1mp

    def _accumulate(l):
        if block_rows % 8 == 0:
            # Sublane-group reduction: pure VPU adds of (8, lane) tiles.
            part = l.reshape(block_rows // 8, 8, lane).sum(axis=0)
        else:
            part = l                  # tiny single-block case (rows < 8)
        out_ref[...] += part[None]

    if full_blocks == padded_blocks:
        # Every block lies fully inside the array: no masking anywhere.
        _accumulate(loss)
    else:
        # Only the last (partial) real block and the ghost blocks created by
        # the 2-way core split pay for masking.
        @pl.when(bi < full_blocks)
        def _full_block():
            _accumulate(loss)

        @pl.when(bi >= full_blocks)
        def _edge_block():
            row = lax.broadcasted_iota(jnp.int32, (block_rows, lane), 0)
            n_valid_rows = rows - bi * block_rows     # scalar; <= 0 for ghosts
            _accumulate(jnp.where(row < n_valid_rows, loss, 0.0))


def _pick_lane(n, max_lane):
    """Largest divisor of n (<= max_lane) with the best lane utilisation."""
    best_d, best_eff = None, 0.0
    for d in range(min(max_lane, n), 0, -1):
        if n % d:
            continue
        eff = d / float(((d + 127) // 128) * 128)
        if eff > best_eff:
            best_d, best_eff = d, eff
        if best_eff >= 0.999:
            break
    return best_d, best_eff


def focal_loss(pred, mask, *, gamma=2.0, alpha=0.25, tile_rows=2048, max_lane=512):
    """pred, mask: same-shape tensors (e.g. [B, 1, H, W]) -> scalar loss (f32)."""
    assert pred.shape == mask.shape, "pred and mask should have the same shape."
    n = int(np.prod(pred.shape))
    assert n > 0

    flat_p = jnp.reshape(pred, (-1,))
    flat_m = jnp.reshape(mask, (-1,))

    # Lane-dense layout (rows, lane) with lane a divisor of n -> free reshape,
    # no HBM copy, no full-tensor pad.
    lane, eff = _pick_lane(n, max_lane)
    if lane is None or eff < 0.70:
        # Pathological size (no decent divisor): pad the flat stream with
        # neutral elements (pred=-100 -> p~0, mask=0) whose loss is exactly 0,
        # so no in-kernel masking of the pad is needed.  Only this rare case
        # pays for an HBM copy.
        lane = 512
        n_total = -(-n // lane) * lane
        flat_p = jnp.pad(flat_p, (0, n_total - n), constant_values=-100.0)
        flat_m = jnp.pad(flat_m, (0, n_total - n))
    else:
        n_total = n

    rows = n_total // lane
    pred2 = flat_p.reshape(rows, lane)      # native dtype; cast happens in-kernel
    mask2 = flat_m.reshape(rows, lane)

    # Row tiling: multiples of 8 sublanes; default 2048 x 512 = 4 MiB f32
    # blocks (2 inputs x 2 pipeline buffers = 16 MiB) to amortise per-step cost.
    if rows < 8:
        block_rows = rows
    else:
        block_rows = max(8, (min(int(tile_rows), rows) // 8) * 8)
    total_blocks = -(-rows // block_rows)
    full_blocks = rows // block_rows          # blocks fully inside the array

    # v7x: split the row-blocks across both TensorCores ("parallel" axis);
    # on single-core v5e/v6e this is just a 2-iteration outer loop.
    n_splits = 2 if total_blocks >= 2 else 1
    inner_steps = -(-total_blocks // n_splits)
    padded_blocks = n_splits * inner_steps    # >= total_blocks (ghosts masked)
    acc_rows = 8 if rows >= 8 else rows
    last_block = total_blocks - 1

    def in_map(i, j):
        # Clamp ghost blocks onto the last real block so no DMA goes fully out
        # of bounds; their contribution is masked to zero inside the kernel.
        return (jnp.minimum(i * inner_steps + j, last_block), 0)

    kernel = functools.partial(
        _focal_loss_kernel,
        gamma=float(gamma), alpha=float(alpha), lane=lane,
        block_rows=block_rows, rows=rows, inner_steps=inner_steps,
        full_blocks=full_blocks, padded_blocks=padded_blocks)

    partials = pl.pallas_call(
        kernel,
        out_shape=jax.ShapeDtypeStruct((n_splits, acc_rows, lane), jnp.float32),
        grid_spec=pltpu.PrefetchScalarGridSpec(
            num_scalar_prefetch=0,
            grid=(n_splits, inner_steps),
            in_specs=[
                pl.BlockSpec((block_rows, lane), in_map),
                pl.BlockSpec((block_rows, lane), in_map),
            ],
            out_specs=pl.BlockSpec((1, acc_rows, lane), lambda i, j: (i, 0, 0)),
        ),
        compiler_params=pltpu.CompilerParams(
            dimension_semantics=("parallel", "arbitrary"),
            vmem_limit_bytes=48 * 1024 * 1024),
    )(pred2, mask2)

    # num_pos + num_neg == numel exactly (num_neg = numel - num_pos), so the
    # denominator is a compile-time constant; combining the (<= 2*8*lane)
    # per-core partials is a trivial XLA epilogue.
    return jnp.sum(partials) / (jnp.float32(n) + 1e-12)


def _focal_loss_ref(pred, mask, gamma=2.0, alpha=0.25):
    p = jax.nn.sigmoid(pred.astype(jnp.float32))
    m = mask.astype(jnp.float32)
    num_pos = jnp.sum(m)
    num_neg = m.size - num_pos
    w_pos = (1.0 - p) ** gamma
    w_neg = p ** gamma
    loss_pos = -alpha * m * w_pos * jnp.log(p + 1e-12)
    loss_neg = -(1.0 - alpha) * (1.0 - m) * w_neg * jnp.log(1.0 - p + 1e-12)
    return (jnp.sum(loss_pos) + jnp.sum(loss_neg)) / (num_pos + num_neg + 1e-12)


if __name__ == "__main__":
    key = jax.random.PRNGKey(0)
    ks = jax.random.split(key, 8)

    def _check(pred, mask, **kw):
        out = jax.block_until_ready(focal_loss(pred, mask, **kw))
        ref = jax.block_until_ready(_focal_loss_ref(pred, mask))
        np.testing.assert_allclose(np.asarray(out), np.asarray(ref),
                                   rtol=1e-5, atol=1e-6)

    # 1) Spec shape [B, 1, H, W]; numel divisible by 128 -> single clean block.
    p1 = jax.random.normal(ks[0], (2, 1, 16, 16), dtype=jnp.float32)
    m1 = jax.random.bernoulli(ks[1], 0.3, (2, 1, 16, 16)).astype(jnp.float32)
    _check(p1, m1)

    # 2) Ragged numel (960): divisor-based lane (480), no pad, no copy.
    p2 = jax.random.normal(ks[2], (2, 1, 20, 24), dtype=jnp.float32)
    m2 = jax.random.bernoulli(ks[3], 0.3, (2, 1, 20, 24)).astype(jnp.float32)
    _check(p2, m2)

    # 3) Multi-block case, run with default tiling and with tiny row-tiles that
    #    force the dual-core split + partial-block + ghost-block mask paths.
    p3 = jax.random.normal(ks[4], (2, 1, 78, 128), dtype=jnp.float32)
    m3 = jax.random.bernoulli(ks[5], 0.3, (2, 1, 78, 128)).astype(jnp.float32)
    _check(p3, m3)
    _check(p3, m3, tile_rows=8)

    # 4) Pathological numel (2*1031, no decent divisor): neutral-pad fallback.
    p4 = jax.random.normal(ks[6], (2, 1, 1031, 1), dtype=jnp.float32)
    m4 = jax.random.bernoulli(ks[7], 0.3, (2, 1, 1031, 1)).astype(jnp.float32)
    _check(p4, m4)

    print("KERNEL_OK")
</pallas_src>

<mosaic_0001>
module attributes {stable_mosaic.version = 11 : i64} {
  func.func @_focal_loss_kernel(%arg0: i32, %arg1: i32, %arg2: memref<1x512xf32, #tpu.memory_space<vmem>>, %arg3: memref<1x512xf32, #tpu.memory_space<vmem>>, %arg4: memref<1x1x512xf32, #tpu.memory_space<vmem>>) attributes {dimension_semantics = [#tpu.dimension_semantics<parallel>, #tpu.dimension_semantics<arbitrary>], iteration_bounds = array<i64: 1, 1>, scalar_prefetch = 0 : i64, scratch_operands = 0 : i64, tpu.core_type = #tpu.core_type<tc>, window_params = [{transform_indices = @transform_0, window_bounds = array<i64: 1, 512>}, {transform_indices = @transform_1, window_bounds = array<i64: 1, 512>}, {transform_indices = @transform_2, window_bounds = array<i64: 1, 1, 512>}]} {
    %c0_i32 = arith.constant 0 : i32
    %0 = arith.cmpi eq, %arg1, %c0_i32 : i32
    %1 = arith.extui %0 : i1 to i32
    %c0_i32_0 = arith.constant 0 : i32
    %2 = arith.cmpi ne, %1, %c0_i32_0 : i32
    scf.if %2 {
      %cst_21 = arith.constant 0.000000e+00 : f32
      %45 = vector.broadcast %cst_21 : f32 to vector<1x1x512xf32>
      %c0_22 = arith.constant 0 : index
      %c0_23 = arith.constant 0 : index
      %c0_24 = arith.constant 0 : index
      %46 = vector.load %arg4[%c0_22, %c0_23, %c0_24] : memref<1x1x512xf32, #tpu.memory_space<vmem>>, vector<1x1x512xf32>
      tpu.vector_store %arg4[%c0_22, %c0_23, %c0_24], %45 {strides = array<i32>} : memref<1x1x512xf32, #tpu.memory_space<vmem>>, vector<1x1x512xf32>,
    } else {
    }
    %c0 = arith.constant 0 : index
    %c0_1 = arith.constant 0 : index
    %3 = vector.load %arg2[%c0, %c0_1] : memref<1x512xf32, #tpu.memory_space<vmem>>, vector<1x512xf32>
    %c0_2 = arith.constant 0 : index
    %c0_3 = arith.constant 0 : index
    %4 = vector.load %arg3[%c0_2, %c0_3] : memref<1x512xf32, #tpu.memory_space<vmem>>, vector<1x512xf32>
    %5 = math.absf %3 : vector<1x512xf32>
    %cst = arith.constant 0.000000e+00 : f32
    %6 = vector.broadcast %cst : f32 to vector<1x512xf32>
    %7 = arith.subf %6, %5 : vector<1x512xf32>
    %8 = math.exp %7 : vector<1x512xf32>
    %cst_4 = arith.constant 1.000000e+00 : f32
    %9 = vector.broadcast %cst_4 : f32 to vector<1x512xf32>
    %10 = arith.addf %9, %8 : vector<1x512xf32>
    %11 = math.log %10 : vector<1x512xf32>
    %cst_5 = arith.constant 0.000000e+00 : f32
    %12 = vector.broadcast %cst_5 : f32 to vector<1x512xf32>
    %13 = arith.minimumf %3, %12 : vector<1x512xf32>
    %14 = arith.subf %13, %11 : vector<1x512xf32>
    %cst_6 = arith.constant -27.6310215 : f32
    %15 = vector.broadcast %cst_6 : f32 to vector<1x512xf32>
    %16 = arith.maximumf %14, %15 : vector<1x512xf32>
    %cst_7 = arith.constant 0.000000e+00 : f32
    %17 = vector.broadcast %cst_7 : f32 to vector<1x512xf32>
    %18 = arith.subf %17, %3 : vector<1x512xf32>
    %cst_8 = arith.constant 0.000000e+00 : f32
    %19 = vector.broadcast %cst_8 : f32 to vector<1x512xf32>
    %20 = arith.minimumf %18, %19 : vector<1x512xf32>
    %21 = arith.subf %20, %11 : vector<1x512xf32>
    %cst_9 = arith.constant -27.6310215 : f32
    %22 = vector.broadcast %cst_9 : f32 to vector<1x512xf32>
    %23 = arith.maximumf %21, %22 : vector<1x512xf32>
    %cst_10 = arith.constant 2.000000e+00 : f32
    %24 = vector.broadcast %cst_10 : f32 to vector<1x512xf32>
    %25 = arith.mulf %24, %23 : vector<1x512xf32>
    %26 = math.exp %25 : vector<1x512xf32>
    %cst_11 = arith.constant 2.000000e+00 : f32
    %27 = vector.broadcast %cst_11 : f32 to vector<1x512xf32>
    %28 = arith.mulf %27, %16 : vector<1x512xf32>
    %29 = math.exp %28 : vector<1x512xf32>
    %cst_12 = arith.constant -2.500000e-01 : f32
    %30 = vector.broadcast %cst_12 : f32 to vector<1x512xf32>
    %31 = arith.mulf %30, %4 : vector<1x512xf32>
    %32 = arith.mulf %31, %26 : vector<1x512xf32>
    %33 = arith.mulf %32, %16 : vector<1x512xf32>
    %cst_13 = arith.constant 1.000000e+00 : f32
    %34 = vector.broadcast %cst_13 : f32 to vector<1x512xf32>
    %35 = arith.subf %34, %4 : vector<1x512xf32>
    %cst_14 = arith.constant 7.500000e-01 : f32
    %36 = vector.broadcast %cst_14 : f32 to vector<1x512xf32>
    %37 = arith.mulf %36, %35 : vector<1x512xf32>
    %38 = arith.mulf %37, %29 : vector<1x512xf32>
    %39 = arith.mulf %38, %23 : vector<1x512xf32>
    %40 = arith.subf %33, %39 : vector<1x512xf32>
    %c0_15 = arith.constant 0 : index
    %c0_16 = arith.constant 0 : index
    %c0_17 = arith.constant 0 : index
    %41 = vector.load %arg4[%c0_15, %c0_16, %c0_17] : memref<1x1x512xf32, #tpu.memory_space<vmem>>, vector<1x1x512xf32>
    %42 = vector.shape_cast %40 : vector<1x512xf32> to vector<1x1x512xf32>
    %43 = arith.addf %41, %42 : vector<1x1x512xf32>
    %c0_18 = arith.constant 0 : index
    %c0_19 = arith.constant 0 : index
    %c0_20 = arith.constant 0 : index
    %44 = vector.load %arg4[%c0_18, %c0_19, %c0_20] : memref<1x1x512xf32, #tpu.memory_space<vmem>>, vector<1x1x512xf32>
    tpu.vector_store %arg4[%c0_18, %c0_19, %c0_20], %43 {strides = array<i32>} : memref<1x1x512xf32, #tpu.memory_space<vmem>>, vector<1x1x512xf32>,
    return
  }
  func.func @transform_0(%arg0: i32, %arg1: i32) -> (i32, i32) {
    %c1_i32 = arith.constant 1 : i32
    %0 = arith.muli %arg0, %c1_i32 : i32
    %1 = arith.addi %0, %arg1 : i32
    %c0_i32 = arith.constant 0 : i32
    %2 = arith.minsi %1, %c0_i32 : i32
    %c0_i32_0 = arith.constant 0 : i32
    %c0_i32_1 = arith.constant 0 : i32
    return %2, %c0_i32_0 : i32, i32
  }
  func.func @transform_1(%arg0: i32, %arg1: i32) -> (i32, i32) {
    %c1_i32 = arith.constant 1 : i32
    %0 = arith.muli %arg0, %c1_i32 : i32
    %1 = arith.addi %0, %arg1 : i32
    %c0_i32 = arith.constant 0 : i32
    %2 = arith.minsi %1, %c0_i32 : i32
    %c0_i32_0 = arith.constant 0 : i32
    %c0_i32_1 = arith.constant 0 : i32
    return %2, %c0_i32_0 : i32, i32
  }
  func.func @transform_2(%arg0: i32, %arg1: i32) -> (i32, i32, i32) {
    %c0_i32 = arith.constant 0 : i32
    %c0_i32_0 = arith.constant 0 : i32
    %c0_i32_1 = arith.constant 0 : i32
    return %arg0, %c0_i32, %c0_i32_0 : i32, i32, i32
  }
}

</mosaic_0001>

<bundles_post_ra>
// kernel: tpu_custom_call.1
= control target key start
LH: loop header
LB: loop body
LE: loop exit
PB: predicated region body
PF: predicated region fallthrough
CT: control target
= control target key end

     0   :  { %7 = vsyncpa [#allocation3], 0  ;;  %s267_s0 = inlined_call_operand.hbm [shape: f32[1,512], index: 0, kind: input, shape index: {}]   ;;  %s268_s1 = inlined_call_operand.hbm [shape: f32[1,512], index: 1, kind: input, shape index: {}]   ;;  %s269_s2 = inlined_call_operand.hbm [shape: f32[1,1,512], index: 2, kind: output, shape index: {}]  }
   0x1   :  { %8 = vsyncpa [#allocation6], 0 }
   0x2   :  { %9 = vsyncpa [#allocation4], 0  ;;  %s204_s9 = smov [#allocation2]   ;;  %s205_s11 = smov [#allocation5]  }
   0x3   :  { %s22_s10 = sshll.u32 %s204_s9, 4  ;;  %s38_s12 = sshll.u32 %s205_s11, 4  ;;  %s23_s10 = int_to_ptr.vmem [resolvable:$true] %s22_s10  ;;  %s39_s12 = int_to_ptr.vmem [resolvable:$true] %s38_s12 }
   0x4   :  { %s132_s15 = scalar_lea.hbm %s267_s0, 64 }
   0x5   :  { %p133_p0 = scmp.ne.s32.totalorder %s267_s0, %s132_s15  ;;  %p136_p1 = scmp.lt.u32.totalorder %s132_s15, %s267_s0 }
   0x7   :  { %p138_p2 = pnand %p136_p1, %p133_p0 }
   0x9   :  { %141 = shalt.err (!%p138_p2)
}
   0xa   :  { %s142_s20 = scalar_lea.vmem %s23_s10, 64  ;;  %p147_p4 = scmp.lt.s32.totalorder %s23_s10, %s23_s10 }
   0xb   :  { %p143_p3 = scmp.ne.s32.totalorder %s23_s10, %s142_s20  ;;  %p148_p5 = scmp.lt.s32.totalorder %s142_s20, %s142_s20 }
   0xd   :  { %p149_p6 = por %p148_p5, %p147_p4 }
   0xf   :  { %p150_p7 = pnand %p149_p6, %p143_p3 }
  0x11   :  { %153 = shalt.err (!%p150_p7)
}
  0x12   :  { %25 = dma.hbm_to_vmem [thread:$0]  %s267_s0, 64, %s23_s10, [#allocation3]  }
  0x13   :  { %s154_s25 = scalar_lea.hbm %s268_s1, 64 }
  0x14   :  { %p155_p8 = scmp.ne.s32.totalorder %s268_s1, %s154_s25  ;;  %p158_p9 = scmp.lt.u32.totalorder %s154_s25, %s268_s1 }
  0x16   :  { %p160_p10 = pnand %p158_p9, %p155_p8 }
  0x18   :  { %163 = shalt.err (!%p160_p10)
}
  0x19   :  { %s164_s30 = scalar_lea.vmem %s39_s12, 64  ;;  %p169_p12 = scmp.lt.s32.totalorder %s39_s12, %s39_s12 }
  0x1a   :  { %p165_p11 = scmp.ne.s32.totalorder %s39_s12, %s164_s30  ;;  %p170_p13 = scmp.lt.s32.totalorder %s164_s30, %s164_s30 }
  0x1c   :  { %p171_p0 = por %p170_p13, %p169_p12 }
  0x1e   :  { %p172_p1 = pnand %p171_p0, %p165_p11 }
  0x20   :  { %175 = shalt.err (!%p172_p1)
}
  0x21   :  { %41 = dma.hbm_to_vmem [thread:$0]  %s268_s1, 64, %s39_s12, [#allocation6]  }
  0x22   :  { %198 = dma.done.wait [#allocation3], 64  }
  0x23   :  { %199 = vsyncadd [#allocation3], 4294967232 }
  0x24   :  { %200 = dma.done.wait [#allocation6], 64  }
  0x25   :  { %201 = vsyncadd [#allocation6], 4294967232  ;;  %v58_v0 = vlaneseq  ;;  %v206_v2 = vmov 0.0   ;;  %v63_v3 = vld [vmem:[#allocation2] sm:$0xf]  ;;  %s207_s1 = smov [#allocation7]  }
  0x26   :  { %v65_v4 = vand.u32 2147483647, %v63_v3  ;;  %v75_v9 = vsub.f32 0.0, %v63_v3  ;;  %v72_v10 = vmin.f32 %v63_v3, 0.0  ;;  %v64_v22 = vld [vmem:[#allocation5] sm:$0xf] }
  0x27   :  { %vm247_vm0 = vcmp.lt.s32.totalorder %v58_v0, 512  ;;  %v88_v23 = vsub.f32 1.0, %v64_v22  ;;  %v85_v24 = vmul.f32 -0.25, %v64_v22  ;;  %s106_s4 = sshll.u32 %s207_s1, 4  ;;  %s107_s4 = int_to_ptr.vmem [resolvable:$true] %s106_s4 }
  0x28   :  { %62 = vst.msk [vmem:[#allocation7] sm:$0xf] %vm247_vm0, %v206_v2  ;;  %v66_v5 = vsub.f32 0.0, %v65_v4  ;;  %v76_v11 = vmin.f32 %v75_v9, 0.0  ;;  %s176_s5 = scalar_lea.vmem %s107_s4, 64  ;;  %p181_p3 = scmp.lt.s32.totalorder %s107_s4, %s107_s4 }
  0x29   :  { %v89_v25 = vmul.f32 0.75, %v88_v23  ;;  %p177_p2 = scmp.ne.s32.totalorder %s107_s4, %s176_s5  ;;  %p182_p4 = scmp.lt.s32.totalorder %s176_s5, %s176_s5 }
  0x2a   :  { %v67_v6 = vmul.f32 1.442695, %v66_v5 }
  0x2b   :  { %p183_p5 = por %p182_p4, %p181_p3 }
  0x2c   :  { %124 = vpow2.f32 %v67_v6 }
  0x2d   :  { %p184_p6 = pnand %p183_p5, %p177_p2 }
  0x2f   :  { %v93_v32 = vld [vmem:[#allocation7] sm:$0xf] }
  0x36   :  { %v125_v7 = vpop.eup %124 }
  0x37   :  { %v69_v8 = vadd.f32 1.0, %v125_v7 }
  0x39   :  { %126 = vlog2.f32 %v69_v8 }
  0x43   :  { %v127_v12 = vpop.eup %126 }
  0x44   :  { %v71_v13 = vmul.f32 0.6931472, %v127_v12 }
  0x46   :  { %v73_v14 = vsub.f32 %v72_v10, %v71_v13  ;;  %v77_v15 = vsub.f32 %v76_v11, %v71_v13 }
  0x48   :  { %v74_v16 = vmax.f32 %v73_v14, -27.631021  ;;  %v78_v17 = vmax.f32 %v77_v15, -27.631021 }
  0x4a   :  { %v79_v18 = vmul.f32 2.0, %v78_v17  ;;  %v82_v19 = vmul.f32 2.0, %v74_v16 }
  0x4c   :  { %v80_v20 = vmul.f32 1.442695, %v79_v18  ;;  %v83_v21 = vmul.f32 1.442695, %v82_v19 }
  0x4e   :  { %128 = vpow2.f32 %v80_v20 }
  0x4f   :  { %130 = vpow2.f32 %v83_v21 }
  0x58   :  { %v129_v26 = vpop.eup %128 }
  0x59   :  { %v131_v27 = vpop.eup %130  ;;  %v86_v28 = vmul.f32 %v129_v26, %v85_v24 }
  0x5a   :  { %v90_v29 = vmul.f32 %v131_v27, %v89_v25 }
  0x5b   :  { %v87_v30 = vmul.f32 %v86_v28, %v74_v16 }
  0x5c   :  { %v91_v31 = vmul.f32 %v90_v29, %v78_v17 }
  0x5e   :  { %v92_v33 = vsub.f32 %v87_v30, %v91_v31 }
  0x60   :  { %v94_v34 = vadd.f32 %v93_v32, %v92_v33 }
  0x62   :  { %99 = vst.msk [vmem:[#allocation7] sm:$0xf] %vm247_vm0, %v94_v34 }
  0x63   :  { %187 = shalt.err (!%p184_p6)
}
  0x64   :  { %s188_s8 = scalar_lea.hbm %s269_s2, 64 }
  0x65   :  { %p189_p7 = scmp.ne.s32.totalorder %s269_s2, %s188_s8  ;;  %p192_p8 = scmp.lt.u32.totalorder %s188_s8, %s269_s2 }
  0x67   :  { %p194_p9 = pnand %p192_p8, %p189_p7 }
  0x69   :  { %197 = shalt.err (!%p194_p9)
}
  0x6a   :  { %109 = dma.vmem_to_hbm [thread:$0]  %s107_s4, 64, %s269_s2, [#allocation4]  }
  0x6b   :  { %202 = dma.done.wait [#allocation4], 64  }
  0x6c   :  { %203 = vsyncadd [#allocation4], 4294967232 }
  0x6d   :  { %113 = vsyncpa [#allocation3], 1 }
  0x6e   :  { %114 = vsyncpa [#allocation6], 1 }
  0x6f   :  { %115 = vsyncpa [#allocation4], 1 }

</bundles_post_ra>
